<compile_context>
chip_gen: v5e
topology: v5e:2x2
jax: 0.10.0
libtpu: 0.0.40
codegen_flags: <defaults>
</compile_context>

<pallas_src>
import jax
import jax.numpy as jnp
from jax.experimental import pallas as pl
from jax.experimental.pallas import tpu as pltpu


def _round_up(x, m):
    return (x + m - 1) // m * m


def bidecoder_kernel(u_ref, i_ref, p_ref, w_ref, out_ref):
    """One row-tile of the DenseBiDecoder forward.

    u_ref:   (TN, D)     user features (row tile, native dtype)
    i_ref:   (TN, D)     item features (row tile, native dtype)
    p_ref:   (D, B*D)    stacked bilinear bases, VMEM-resident across grid steps
    w_ref:   (B*D, C)    expanded combine weight, VMEM-resident across grid steps
    out_ref: (TN, C)     logits (row tile)
    """
    u = u_ref[...]                                   # native dtype, no up-cast
    v = i_ref[...]
    d = v.shape[1]
    num_basis = p_ref.shape[1] // d

    # Single fused MXU call over all bases:
    #   t_all[a, b*D + j] = sum_i u[a, i] * P[b, i, j]
    t_all = jnp.dot(u, p_ref[...], preferred_element_type=jnp.float32)   # (TN, B*D) f32

    # Cast first (half the VPU cast width), then replicate along lanes (XLU).
    v32 = v.astype(jnp.float32)                                          # (TN, D)
    v_rep = jnp.tile(v32, (1, num_basis))                                # (TN, B*D)
    prod = t_all * v_rep                                                 # f32 VPU

    # Fused "reduce over j within each basis" + "combine over bases":
    #   out[a, c] = sum_{b,j} prod[a, b*D + j] * W_expand[b*D + j, c]
    out = jnp.dot(prod, w_ref[...].astype(jnp.float32),
                  preferred_element_type=jnp.float32)                    # (TN, C)
    out_ref[...] = out.astype(out_ref.dtype)


def dense_bi_decoder(ufeat, ifeat, P, combine_w, *, row_tile=1024):
    """DenseBiDecoder forward (dropout p=0.0 -> identity).

    ufeat, ifeat: (N, D)   f32 or bf16
    P:            (B, D, D)
    combine_w:    (C, B)   PyTorch Linear weight layout (num_classes, num_basis)
    """
    N, D = ufeat.shape
    B = P.shape[0]
    C = combine_w.shape[0]

    # Tiny-parameter reshuffles stay in plain JAX (negligible bytes).
    # P_stacked[i, b*D + j] = P[b, i, j]
    p_stacked = jnp.transpose(P, (1, 0, 2)).reshape(D, B * D)
    # W_expand[b*D + j, c] = combine_w[c, b]
    w_expand = jnp.repeat(combine_w.T, D, axis=0)                        # (B*D, C)

    # Row tile: sublane multiple depends on input dtype (bf16 packs 16/sublane).
    sub = 16 if ufeat.dtype == jnp.bfloat16 else 8
    if N <= row_tile:
        TN = N                                  # single block, full extent
    else:
        TN = _round_up(row_tile, sub)
    # NOTE: no wrapper-side padding — Pallas handles the partial last block;
    # the computation is row-independent so padded rows never leak into valid ones.
    grid = (pl.cdiv(N, TN),)

    out_dtype = ufeat.dtype
    in_bytes = jnp.dtype(ufeat.dtype).itemsize

    cost = pl.CostEstimate(
        flops=2 * N * D * (B * D)               # fused basis matmul
        + N * (B * D)                           # elementwise product
        + 2 * N * (B * D) * C,                  # fused reduce+combine matmul
        transcendentals=0,
        bytes_accessed=(2 * N * D) * in_bytes
        + (D * B * D + B * D * C) * jnp.dtype(p_stacked.dtype).itemsize
        + N * C * jnp.dtype(out_dtype).itemsize,
    )

    out = pl.pallas_call(
        bidecoder_kernel,
        out_shape=jax.ShapeDtypeStruct((N, C), out_dtype),
        grid=grid,
        in_specs=[
            pl.BlockSpec((TN, D), lambda i: (i, 0)),        # ufeat row tile
            pl.BlockSpec((TN, D), lambda i: (i, 0)),        # ifeat row tile
            pl.BlockSpec((D, B * D), lambda i: (0, 0)),     # P_stacked, resident
            pl.BlockSpec((B * D, C), lambda i: (0, 0)),     # W_expand, resident
        ],
        out_specs=pl.BlockSpec((TN, C), lambda i: (i, 0)),
        compiler_params=pltpu.CompilerParams(
            dimension_semantics=("parallel",),              # shard rows across TCs
        ),
        cost_estimate=cost,
    )(ufeat, ifeat, p_stacked, w_expand)

    return out


def xavier_uniform(key, shape, fan_in, fan_out, dtype=jnp.float32):
    bound = (6.0 / (fan_in + fan_out)) ** 0.5
    return jax.random.uniform(key, shape, dtype, minval=-bound, maxval=bound)


if __name__ == "__main__":
    # Small shapes consistent with the module's forward.  N deliberately NOT a
    # multiple of the row tile so the partial-last-block (unpadded) path is
    # exercised, and row_tile chosen so the grid has several pipelined steps.
    N = 1000         # number of (user, item) pairs
    in_units = 32
    num_basis = 2
    num_classes = 4

    key = jax.random.PRNGKey(0)
    k_u, k_i, k_p, k_w = jax.random.split(key, 4)

    ufeat = jax.random.normal(k_u, (N, in_units), jnp.float32)
    ifeat = jax.random.normal(k_i, (N, in_units), jnp.float32)

    # Deterministic parameter init mirroring xavier_uniform_ in reset_parameters().
    # P: (B, D, D) -> PyTorch fan_in = D*D, fan_out = B*D
    P = xavier_uniform(k_p, (num_basis, in_units, in_units),
                       fan_in=in_units * in_units, fan_out=num_basis * in_units)
    # Linear weight: (num_classes, num_basis) -> fan_in = num_basis, fan_out = num_classes
    combine_w = xavier_uniform(k_w, (num_classes, num_basis),
                               fan_in=num_basis, fan_out=num_classes)

    out = dense_bi_decoder(ufeat, ifeat, P, combine_w, row_tile=256)
    out = jax.block_until_ready(out)

    # Pure-JAX reference for sanity (dropout p=0.0 is identity).
    ref = jnp.einsum('ai,bij,aj->ab', ufeat, P, ifeat) @ combine_w.T
    assert out.shape == (N, num_classes)
    assert jnp.allclose(out, ref, atol=1e-3, rtol=1e-3), "mismatch vs reference"

    # Also exercise the default (large) row tile with a single-block grid.
    out2 = jax.block_until_ready(dense_bi_decoder(ufeat, ifeat, P, combine_w))
    assert jnp.allclose(out2, ref, atol=1e-3, rtol=1e-3), "mismatch vs reference (big tile)"

    print("KERNEL_OK")
</pallas_src>

<mosaic_0001>
module attributes {stable_mosaic.version = 11 : i64} {
  func.func @bidecoder_kernel(%arg0: i32, %arg1: memref<256x32xf32, #tpu.memory_space<vmem>>, %arg2: memref<256x32xf32, #tpu.memory_space<vmem>>, %arg3: memref<32x64xf32, #tpu.memory_space<vmem>>, %arg4: memref<64x4xf32, #tpu.memory_space<vmem>>, %arg5: memref<256x4xf32, #tpu.memory_space<vmem>>) attributes {dimension_semantics = [#tpu.dimension_semantics<parallel>], iteration_bounds = array<i64: 4>, scalar_prefetch = 0 : i64, scratch_operands = 0 : i64, tpu.core_type = #tpu.core_type<tc>, window_params = [{transform_indices = @transform_0, window_bounds = array<i64: 256, 32>}, {transform_indices = @transform_1, window_bounds = array<i64: 256, 32>}, {pipeline_mode = #tpu.pipeline_mode<synchronous>, transform_indices = @transform_2, window_bounds = array<i64: 32, 64>}, {pipeline_mode = #tpu.pipeline_mode<synchronous>, transform_indices = @transform_3, window_bounds = array<i64: 64, 4>}, {transform_indices = @transform_4, window_bounds = array<i64: 256, 4>}]} {
    %c0 = arith.constant 0 : index
    %c0_0 = arith.constant 0 : index
    %0 = vector.load %arg1[%c0, %c0_0] : memref<256x32xf32, #tpu.memory_space<vmem>>, vector<256x32xf32>
    %c0_1 = arith.constant 0 : index
    %c0_2 = arith.constant 0 : index
    %1 = vector.load %arg2[%c0_1, %c0_2] : memref<256x32xf32, #tpu.memory_space<vmem>>, vector<256x32xf32>
    %c0_3 = arith.constant 0 : index
    %c0_4 = arith.constant 0 : index
    %2 = vector.load %arg3[%c0_3, %c0_4] : memref<32x64xf32, #tpu.memory_space<vmem>>, vector<32x64xf32>
    %cst = arith.constant dense<0.000000e+00> : vector<256x64xf32>
    %3 = tpu.matmul %0, %2, %cst {dimension_numbers = #tpu.dot_dimension_numbers<[1], [0], [0], [1], [0, 0, 1, 1], [], []>} : vector<256x32xf32>, vector<32x64xf32>, vector<256x64xf32> -> vector<256x64xf32>
    %4 = tpu.concatenate %1, %1 in 1 : vector<256x32xf32>, vector<256x32xf32> -> vector<256x64xf32>
    %5 = arith.mulf %3, %4 : vector<256x64xf32>
    %c0_5 = arith.constant 0 : index
    %c0_6 = arith.constant 0 : index
    %6 = vector.load %arg4[%c0_5, %c0_6] : memref<64x4xf32, #tpu.memory_space<vmem>>, vector<64x4xf32>
    %cst_7 = arith.constant dense<0.000000e+00> : vector<256x4xf32>
    %7 = tpu.matmul %5, %6, %cst_7 {dimension_numbers = #tpu.dot_dimension_numbers<[1], [0], [0], [1], [0, 0, 1, 1], [], []>} : vector<256x64xf32>, vector<64x4xf32>, vector<256x4xf32> -> vector<256x4xf32>
    %c0_8 = arith.constant 0 : index
    %c0_9 = arith.constant 0 : index
    %8 = vector.load %arg5[%c0_8, %c0_9] : memref<256x4xf32, #tpu.memory_space<vmem>>, vector<256x4xf32>
    tpu.vector_store %arg5[%c0_8, %c0_9], %7 {strides = array<i32>} : memref<256x4xf32, #tpu.memory_space<vmem>>, vector<256x4xf32>,
    return
  }
  func.func @transform_0(%arg0: i32) -> (i32, i32) {
    %c0_i32 = arith.constant 0 : i32
    %c0_i32_0 = arith.constant 0 : i32
    return %arg0, %c0_i32 : i32, i32
  }
  func.func @transform_1(%arg0: i32) -> (i32, i32) {
    %c0_i32 = arith.constant 0 : i32
    %c0_i32_0 = arith.constant 0 : i32
    return %arg0, %c0_i32 : i32, i32
  }
  func.func @transform_2(%arg0: i32) -> (i32, i32) {
    %c0_i32 = arith.constant 0 : i32
    %c0_i32_0 = arith.constant 0 : i32
    %c0_i32_1 = arith.constant 0 : i32
    return %c0_i32, %c0_i32_0 : i32, i32
  }
  func.func @transform_3(%arg0: i32) -> (i32, i32) {
    %c0_i32 = arith.constant 0 : i32
    %c0_i32_0 = arith.constant 0 : i32
    %c0_i32_1 = arith.constant 0 : i32
    return %c0_i32, %c0_i32_0 : i32, i32
  }
  func.func @transform_4(%arg0: i32) -> (i32, i32) {
    %c0_i32 = arith.constant 0 : i32
    %c0_i32_0 = arith.constant 0 : i32
    return %arg0, %c0_i32 : i32, i32
  }
}

</mosaic_0001>

<bundles_post_ra>
// kernel: tpu_custom_call.1
= control target key start
LH: loop header
LB: loop body
LE: loop exit
PB: predicated region body
PF: predicated region fallthrough
CT: control target
= control target key end

     0   :  { %s1642_s15 = smov 0   ;;  %s1644_s16 = smov 0   ;;  %s2296_s0 = inlined_call_operand.vmem [shape: f32[1000,32], index: 0, kind: input, shape index: {}]   ;;  %s2297_s1 = inlined_call_operand.vmem [shape: f32[1000,32], index: 1, kind: input, shape index: {}]   ;;  %s2298_s2 = inlined_call_operand.vmem [shape: f32[32,64], index: 2, kind: input, shape index: {}]   ;;  %s2299_s3 = inlined_call_operand.vmem [shape: f32[64,4], index: 3, kind: input, shape index: {}]   ;;  %s2300_s4 = inlined_call_operand.vmem [shape: f32[1000,4], index: 4, kind: output, shape index: {}]  }
   0x1   :  { %s1646_s17 = smov 0  }
   0x2 LB: > { %s1655_s18 = sadd.s32 4294967295, %s1582_s17   ;;  %s1657_s19 = sadd.s32 1, %s1582_s17   ;;  %s1582_s17 = sphi %s1646_s17, %s2309_s17   ;;  %s1578_s16 = sphi %s1644_s16, %s2308_s16   ;;  %s1574_s15 = sphi %s1642_s15, %s2307_s15  }
   0x3   : > { %s112_s20 = ssub.s32 %s1582_s17, %s1657_s19  ;;  %s115_s21 = sadd.s32 1, %s1578_s16 }
   0x4   : > { %p113_p0 = scmp.eq.s32.totalorder %s112_s20, 0  ;;  %p125_p1 = scmp.ne.s32.totalorder %s1578_s16, %s1574_s15 }
   0x5   : > { %p126_p2 = scmp.eq.s32.totalorder %s1655_s18, 3  ;;  %p1337_p3 = scmp.ge.s32.totalorder %s1582_s17, 1 }
   0x6   : > { %s1665_s22 = scalar_select %p113_p0, %s1578_s16, %s115_s21  }
   0x7   : > { %p1667_p4 = por %p126_p2, %p125_p1  ;;  %p190_p5 = scmp.lt.s32.totalorder %s1582_s17, 5 }
   0x9   : > { %p191_p6 = pnand %p1337_p3, %p190_p5 }
   0xa   : > { %s1678_s28 = sshll.u32 (!%p191_p6), %s1655_s18, 5  ;;  %s1616_s17 = smov (!%p191_p6), 32  }
   0xb   : > { %194 = sbr.rel (%p191_p6) target bundleno = 597 (0x255), region = 36  ;;  %p233_p7 = scmp.lt.s32.totalorder (!%p191_p6), %s1678_s28, 124 }
  0x10   : > { %v328_v0 = vld [vmem:[%s2298_s2 + $0x18] sm:$0xff]  ;;  %v327_v1 = vld [vmem:[%s2298_s2 + $0x10] sm:$0xff]  ;;  %v326_v2 = vld [vmem:[%s2298_s2 + $0x8] sm:$0xff]  ;;  %s234_s5 = scalar_select %p233_p7, %s1678_s28, 124  ;;  %vm329_vm0 = vcmask 261120   ;;  %vm739_vm1 = vcmask 523264  }
  0x11   : > { %438 = vmatpush.msra.mxu0 %v328_v0  ;;  %1427 = vmatpush.msra.mxu3 %v328_v0  ;;  %v325_v3 = vld [vmem:[%s2298_s2] sm:$0xff]  ;;  %v738_v39 = vld [vmem:[%s2299_s3 + $0x38] sm:$0xff]  ;;  %v737_v42 = vld [vmem:[%s2299_s3 + $0x30] sm:$0xff]  ;;  %vm949_vm2 = vcmask 31744   ;;  %s1424_s20 = sshll.u32 (%p1667_p4), %s1655_s18, 8 }
  0x12   : > { %s1340_s8 = sshll.u32 %s234_s5, 3  ;;  %844 = vmatpush.msra.mxu1 %v738_v39  ;;  %v736_v43 = vld [vmem:[%s2299_s3 + $0x28] sm:$0xff]  ;;  %1431 = vmatpush.msra.mxu2 %v738_v39  ;;  %v735_v44 = vld [vmem:[%s2299_s3 + $0x20] sm:$0xff]  ;;  %v734_v46 = vld [vmem:[%s2299_s3 + $0x18] sm:$0xff]  ;;  %s2161_s25 = scalar_lea.vmem (%p1667_p4), %s2300_s4, %s1424_s20  }
  0x13   : > { %439 = vmatpush.msra.mxu0 %v327_v1  ;;  %1428 = vmatpush.msra.mxu3 %v327_v1  ;;  %s1691_s11 = scalar_lea.vmem %s2296_s0, %s1340_s8  ;;  %s1696_s14 = scalar_lea.vmem %s2297_s1, %s1340_s8  ;;  %v733_v49 = vld [vmem:[%s2299_s3 + $0x10] sm:$0xff]  ;;  %v732_v50 = vld [vmem:[%s2299_s3 + $0x8] sm:$0xff]  ;;  %v731_v52 = vld [vmem:[%s2299_s3] sm:$0xff] }
  0x14   : > { %v261_v4 = vld [vmem:[%s1691_s11] sm:$0xff]  ;;  %v1706_v6 = vld [vmem:[%s1696_s14 + $0x88] sm:$0xff]  ;;  %v1721_v10 = vld [vmem:[%s1696_s14 + $0x90] sm:$0xff]  ;;  %845 = vmatpush.msra.mxu1 %v737_v42  ;;  %1432 = vmatpush.msra.mxu2 %v737_v42 }
  0x15   : > { %440 = vmatpush.msra.mxu0 %v326_v2  ;;  %1429 = vmatpush.msra.mxu3 %v326_v2  ;;  %v1700_v5 = vld [vmem:[%s1696_s14 + $0x80] sm:$0xff]  ;;  %v262_v7 = vld [vmem:[%s1691_s11 + $0x8] sm:$0xff]  ;;  %v263_v11 = vld [vmem:[%s1691_s11 + $0x10] sm:$0xff] }
  0x16   : > { %603 = vrot.lane.b32.xlu0 %v1700_v5, %s1616_s17  ;;  %605 = vrot.lane.b32.xlu1 %v1706_v6, %s1616_s17  ;;  %v1712_v8 = vld [vmem:[%s1696_s14] sm:$0xff]  ;;  %v1715_v9 = vld [vmem:[%s1696_s14 + $0x8] sm:$0xff] }
  0x17   : > { %441 = vmatpush.msra.mxu0 %v325_v3  ;;  %1430 = vmatpush.msra.mxu3 %v325_v3  ;;  %v1729_v12 = vld [vmem:[%s1696_s14 + $0x98] sm:$0xff]  ;;  %v1738_v14 = vld [vmem:[%s1696_s14 + $0x10] sm:$0xff]  ;;  %v1746_v16 = vld [vmem:[%s1696_s14 + $0x20] sm:$0xff] }
  0x18   : > { %1343 = vmatmul.msk.f32.vlgmr.msra.gmra.mxu0 %vm329_vm0, %v261_v4  ;;  %607 = vrot.lane.b32.xlu2 %v1721_v10, %s1616_s17  ;;  %v1732_v13 = vld [vmem:[%s1696_s14 + $0x18] sm:$0xff]  ;;  %v1749_v17 = vld [vmem:[%s1696_s14 + $0xa8] sm:$0xff]  ;;  %v265_v18 = vld [vmem:[%s1691_s11 + $0x20] sm:$0xff] }
  0x19   : > { %v264_v15 = vld [vmem:[%s1691_s11 + $0x18] sm:$0xff]  ;;  %v1758_v19 = vld [vmem:[%s1696_s14 + $0xb0] sm:$0xff]  ;;  %v1767_v21 = vld [vmem:[%s1696_s14 + $0xa0] sm:$0xff]  ;;  %846 = vmatpush.msra.mxu1 %v736_v43  ;;  %1433 = vmatpush.msra.mxu2 %v736_v43 }
  0x1a   : > { %v1761_v20 = vld [vmem:[%s1696_s14 + $0x30] sm:$0xff]  ;;  %v266_v22 = vld [vmem:[%s1691_s11 + $0x28] sm:$0xff]  ;;  %v1775_v23 = vld [vmem:[%s1696_s14 + $0x38] sm:$0xff] }
  0x1b   : > { %v1781_v24 = vld [vmem:[%s1696_s14 + $0x28] sm:$0xff]  ;;  %v1784_v25 = vld [vmem:[%s1696_s14 + $0xc0] sm:$0xff]  ;;  %v267_v26 = vld [vmem:[%s1691_s11 + $0x30] sm:$0xff]  ;;  %847 = vmatpush.msra.mxu1 %v735_v44  ;;  %1434 = vmatpush.msra.mxu2 %v735_v44 }
  0x1c   : > { %v1793_v27 = vld [vmem:[%s1696_s14 + $0x48] sm:$0xff]  ;;  %v268_v29 = vld [vmem:[%s1691_s11 + $0x38] sm:$0xff]  ;;  %v1808_v31 = vld [vmem:[%s1696_s14 + $0x50] sm:$0xff] }
  0x1d   : > { %v1796_v28 = vld [vmem:[%s1696_s14 + $0xc8] sm:$0xff]  ;;  %v1805_v30 = vld [vmem:[%s1696_s14 + $0xb8] sm:$0xff]  ;;  %v269_v32 = vld [vmem:[%s1691_s11 + $0x40] sm:$0xff]  ;;  %848 = vmatpush.msra.mxu1 %v734_v46  ;;  %1435 = vmatpush.msra.mxu2 %v734_v46 }
  0x1e   : > { %571 = vrot.lane.b32.xlu0 %v1712_v8, %s1616_s17  ;;  %573 = vrot.lane.b32.xlu1 %v1715_v9, %s1616_s17  ;;  %v1817_v33 = vld [vmem:[%s1696_s14 + $0x40] sm:$0xff]  ;;  %v1820_v34 = vld [vmem:[%s1696_s14 + $0xd8] sm:$0xff] }
  0x1f   : > { %v270_v35 = vld [vmem:[%s1691_s11 + $0x48] sm:$0xff]  ;;  %v1829_v36 = vld [vmem:[%s1696_s14 + $0x60] sm:$0xff]  ;;  %v271_v38 = vld [vmem:[%s1691_s11 + $0x50] sm:$0xff]  ;;  %849 = vmatpush.msra.mxu1 %v733_v49  ;;  %1436 = vmatpush.msra.mxu2 %v733_v49 }
  0x20   : > { %1344 = vmatmul.msk.f32.gmra.mxu0 %vm329_vm0, %v262_v7  ;;  %575 = vrot.lane.b32.xlu2 %v1738_v14, %s1616_s17  ;;  %v1832_v37 = vld [vmem:[%s1696_s14 + $0xe0] sm:$0xff]  ;;  %v1844_v40 = vld [vmem:[%s1696_s14 + $0xd0] sm:$0xff]  ;;  %v1847_v41 = vld [vmem:[%s1696_s14 + $0x68] sm:$0xff] }
  0x21   : > { %v272_v45 = vld [vmem:[%s1691_s11 + $0x58] sm:$0xff]  ;;  %v1871_v48 = vld [vmem:[%s1696_s14 + $0xf0] sm:$0xff]  ;;  %v273_v51 = vld [vmem:[%s1691_s11 + $0x60] sm:$0xff]  ;;  %850 = vmatpush.msra.mxu1 %v732_v50  ;;  %1437 = vmatpush.msra.mxu2 %v732_v50 }
  0x22   : > { %v1868_v47 = vld [vmem:[%s1696_s14 + $0x58] sm:$0xff]  ;;  %v278_v53 = vld [vmem:[%s1691_s11 + $0x88] sm:$0xff]  ;;  %v279_v56 = vld [vmem:[%s1691_s11 + $0x90] sm:$0xff] }
  0x23   : > { %851 = vmatpush.msra.mxu1 %v731_v52  ;;  %1360 = vmatmul.msk.f32.vlgmr.msra.gmra.mxu3 %vm329_vm0, %v278_v53  ;;  %v1891_v54 = vld [vmem:[%s1696_s14 + $0x78] sm:$0xff]  ;;  %v274_v55 = vld [vmem:[%s1691_s11 + $0x68] sm:$0xff]  ;;  %v275_v58 = vld [vmem:[%s1691_s11 + $0x70] sm:$0xff] }
  0x24   : > { %1438 = vmatpush.msra.mxu2 %v731_v52  ;;  %v1900_v57 = vld [vmem:[%s1696_s14 + $0xe8] sm:$0xff]  ;;  %v1907_v59 = vld [vmem:[%s1696_s14 + $0x70] sm:$0xff]  ;;  %v280_v60 = vld [vmem:[%s1691_s11 + $0x98] sm:$0xff] }
  0x25   : > { %v276_v62 = vld [vmem:[%s1691_s11 + $0x78] sm:$0xff]  ;;  %v281_v0 = vld [vmem:[%s1691_s11 + $0xa0] sm:$0xff] }
  0x26   : > { %609 = vrot.lane.b32.xlu0 %v1729_v12, %s1616_s17  ;;  %577 = vrot.lane.b32.xlu1 %v1732_v13, %s1616_s17  ;;  %v277_v4 = vld [vmem:[%s1691_s11 + $0x80] sm:$0xff] }
  0x27   : > { %v285_v50 = vld [vmem:[%s1691_s11 + $0xc0] sm:$0xff] }
  0x28   : > { %1345 = vmatmul.msk.f32.gmra.mxu0 %vm329_vm0, %v263_v11  ;;  %611 = vrot.lane.b32.xlu2 %v1767_v21, %s1616_s17 }
  0x2b   : > { %1361 = vmatmul.msk.f32.gmra.mxu3 %vm329_vm0, %v279_v56  ;;  %v286_v56 = vld [vmem:[%s1691_s11 + $0xc8] sm:$0xff] }
  0x2e   : > { %579 = vrot.lane.b32.xlu0 %v1746_v16, %s1616_s17  ;;  %613 = vrot.lane.b32.xlu1 %v1749_v17, %s1616_s17 }
  0x30   : > { %1346 = vmatmul.msk.f32.gmra.mxu0 %vm329_vm0, %v264_v15  ;;  %581 = vrot.lane.b32.xlu2 %v1781_v24, %s1616_s17 }
  0x33   : > { %1362 = vmatmul.msk.f32.gmra.mxu3 %vm329_vm0, %v280_v60 }
  0x36   : > { %615 = vrot.lane.b32.xlu0 %v1758_v19, %s1616_s17  ;;  %583 = vrot.lane.b32.xlu1 %v1761_v20, %s1616_s17 }
  0x38   : > { %1347 = vmatmul.msk.f32.gmra.mxu0 %vm329_vm0, %v265_v18  ;;  %617 = vrot.lane.b32.xlu2 %v1805_v30, %s1616_s17  ;;  %v282_v18 = vld [vmem:[%s1691_s11 + $0xa8] sm:$0xff] }
  0x3b   : > { %1363 = vmatmul.msk.f32.gmra.mxu3 %vm329_vm0, %v281_v0 }
  0x3e   : > { %585 = vrot.lane.b32.xlu0 %v1775_v23, %s1616_s17  ;;  %619 = vrot.lane.b32.xlu1 %v1784_v25, %s1616_s17 }
  0x40   : > { %1348 = vmatmul.msk.f32.gmra.mxu0 %vm329_vm0, %v266_v22  ;;  %587 = vrot.lane.b32.xlu2 %v1817_v33, %s1616_s17 }
  0x43   : > { %1364 = vmatmul.msk.f32.gmra.mxu3 %vm329_vm0, %v282_v18 }
  0x46   : > { %589 = vrot.lane.b32.xlu1 %v1793_v27, %s1616_s17  ;;  %621 = vrot.lane.b32.xlu0 %v1796_v28, %s1616_s17 }
  0x48   : > { %1349 = vmatmul.msk.f32.gmra.mxu0 %vm329_vm0, %v267_v26  ;;  %623 = vrot.lane.b32.xlu2 %v1844_v40, %s1616_s17 }
  0x4e   : > { %591 = vrot.lane.b32.xlu0 %v1808_v31, %s1616_s17  ;;  %625 = vrot.lane.b32.xlu1 %v1820_v34, %s1616_s17 }
  0x50   : > { %1350 = vmatmul.msk.f32.gmra.mxu0 %vm329_vm0, %v268_v29  ;;  %593 = vrot.lane.b32.xlu2 %v1868_v47, %s1616_s17 }
  0x56   : > { %595 = vrot.lane.b32.xlu1 %v1829_v36, %s1616_s17  ;;  %627 = vrot.lane.b32.xlu0 %v1832_v37, %s1616_s17 }
  0x58   : > { %1351 = vmatmul.msk.f32.gmra.mxu0 %vm329_vm0, %v269_v32  ;;  %629 = vrot.lane.b32.xlu2 %v1900_v57, %s1616_s17  ;;  %v283_v32 = vld [vmem:[%s1691_s11 + $0xb0] sm:$0xff] }
  0x59   : > { %1365 = vmatmul.msk.f32.gmra.mxu3 %vm329_vm0, %v283_v32 }
  0x5e   : > { %597 = vrot.lane.b32.xlu0 %v1847_v41, %s1616_s17  ;;  %631 = vrot.lane.b32.xlu1 %v1871_v48, %s1616_s17 }
  0x60   : > { %1352 = vmatmul.msk.f32.gmra.mxu0 %vm329_vm0, %v270_v35  ;;  %599 = vrot.lane.b32.xlu2 %v1907_v59, %s1616_s17 }
  0x66   : > { %601 = vrot.lane.b32.xlu1 %v1891_v54, %s1616_s17 }
  0x68   : > { %1353 = vmatmul.msk.f32.gmra.mxu0 %vm329_vm0, %v271_v38 }
  0x70   : > { %1354 = vmatmul.msk.f32.gmra.mxu0 %vm329_vm0, %v272_v45 }
  0x72   : > { %v1924_v11 = vpop.permute.xlu2 %607 }
  0x78   : > { %1355 = vmatmul.msk.f32.gmra.mxu0 %vm329_vm0, %v273_v51 }
  0x7a   : > { %v576_v29 = vpop.permute.xlu2 %575 }
  0x7b   : > { %v669_v35 = vsel %vm329_vm0, %v1738_v14, %v576_v29  ;;  %v289_v29 = vld [vmem:[%s1691_s11 + $0xe0] sm:$0xff] }
  0x80   : > { %1356 = vmatmul.msk.f32.gmra.mxu0 %vm329_vm0, %v274_v55 }
  0x82   : > { %v1944_v49 = vpop.permute.xlu2 %611 }
  0x88   : > { %1357 = vmatmul.msk.f32.gmra.mxu0 %vm329_vm0, %v275_v58  ;;  %v1913_v61 = vpop.permute.xlu0 %603  ;;  %v1916_v63 = vpop.permute.xlu1 %605 }
  0x90   : > { %1358 = vmatmul.msk.f32.gmra.mxu0 %vm329_vm0, %v276_v62  ;;  %v572_v1 = vpop.permute.xlu0 %571  ;;  %v574_v15 = vpop.permute.xlu1 %573 }
  0x91   : > { %v667_v2 = vsel %vm329_vm0, %v1712_v8, %v572_v1  ;;  %v668_v22 = vsel %vm329_vm0, %v1715_v9, %v574_v15  ;;  %v284_v9 = vld [vmem:[%s1691_s11 + $0xb8] sm:$0xff]  ;;  %v287_v1 = vld [vmem:[%s1691_s11 + $0xd0] sm:$0xff] }
  0x92   : > { %1366 = vmatmul.msk.f32.gmra.mxu3 %vm329_vm0, %v284_v9  ;;  %v288_v15 = vld [vmem:[%s1691_s11 + $0xd8] sm:$0xff] }
  0x95   : > { %v443_v3 = vpop.f32.mrf.mxu0 }
  0x96   : > { %v699_v7 = vmul.f32 %v667_v2, %v443_v3 }
  0x98   : > { %1359 = vmatmul.msk.f32.gmra.mxu0 %vm329_vm0, %v277_v4  ;;  %1375 = vmatmul.msk.f32.vlgmr.msra.gmra.mxu1 %vm739_vm1, %v699_v7  ;;  %v1937_v42 = vpop.permute.xlu0 %609  ;;  %v578_v43 = vpop.permute.xlu1 %577 }
  0x99   : > { %v670_v44 = vsel %vm329_vm0, %v1732_v13, %v578_v43  ;;  %v582_v13 = vpop.permute.xlu2 %581  ;;  %v290_v43 = vld [vmem:[%s1691_s11 + $0xe8] sm:$0xff] }
  0x9a   : > { %1367 = vmatmul.msk.f32.gmra.mxu3 %vm329_vm0, %v285_v50  ;;  %v672_v58 = vsel %vm329_vm0, %v1781_v24, %v582_v13  ;;  %v292_v13 = vld [vmem:[%s1691_s11 + $0xf8] sm:$0xff] }
  0x9d   : > { %v446_v8 = vpop.f32.mrf.mxu0 }
  0x9e   : > { %v700_v26 = vmul.f32 %v668_v22, %v446_v8 }
  0xa0   : > { %1376 = vmatmul.msk.f32.gmra.mxu1 %vm739_vm1, %v700_v26  ;;  %v580_v14 = vpop.permute.xlu0 %579  ;;  %v1951_v55 = vpop.permute.xlu1 %613 }
  0xa1   : > { %v671_v51 = vsel %vm329_vm0, %v1746_v16, %v580_v14  ;;  %v1965_v7 = vpop.permute.xlu2 %617  ;;  %v291_v14 = vld [vmem:[%s1691_s11 + $0xf0] sm:$0xff]  ;;  %s225_s11 = sand.u32 1, %s1574_s15   ;;  %s990_s15 = ssub.s32 (%p1667_p4), 125, %s1678_s28 }
  0xa2   : > { %1368 = vmatmul.msk.f32.gmra.mxu3 %vm329_vm0, %v286_v56  ;;  %p991_p8 = scmp.lt.s32.totalorder (%p1667_p4), %s990_s15, 32 }
  0xa5   : > { %v449_v38 = vpop.f32.mrf.mxu0 }
  0xa6   : > { %v701_v39 = vmul.f32 %v669_v35, %v449_v38 }
  0xa8   : > { %1377 = vmatmul.msk.f32.gmra.mxu1 %vm739_vm1, %v701_v39  ;;  %v1958_v0 = vpop.permute.xlu0 %615  ;;  %v584_v16 = vpop.permute.xlu1 %583 }
  0xa9   : > { %v673_v2 = vsel %vm329_vm0, %v1761_v20, %v584_v16  ;;  %v588_v20 = vpop.permute.xlu2 %587 }
  0xaa   : > { %1369 = vmatmul.msk.f32.gmra.mxu3 %vm329_vm0, %v287_v1  ;;  %v675_v32 = vsel %vm329_vm0, %v1817_v33, %v588_v20 }
  0xad   : > { %v452_v45 = vpop.f32.mrf.mxu0 }
  0xae   : > { %v702_v46 = vmul.f32 %v670_v44, %v452_v45 }
  0xb0   : > { %1378 = vmatmul.msk.f32.gmra.mxu1 %vm739_vm1, %v702_v46  ;;  %v586_v24 = vpop.permute.xlu0 %585  ;;  %v1972_v26 = vpop.permute.xlu1 %619 }
  0xb1   : > { %v674_v18 = vsel %vm329_vm0, %v1775_v23, %v586_v24  ;;  %v1986_v46 = vpop.permute.xlu2 %623  ;;  %v2009_v24 = vld [vmem:[%s1696_s14 + $0xf8] sm:$0xff]  ;;  %s1338_s14 = sshll.u32 %s225_s11, 8 }
  0xb2   : > { %1370 = vmatmul.msk.f32.gmra.mxu3 %vm329_vm0, %v288_v15  ;;  %633 = vrot.lane.b32.xlu0 %v2009_v24, %s1616_s17  ;;  %s2028_s17 = scalar_lea.vmem [#allocation2], %s1338_s14  }
  0xb5   : > { %v455_v52 = vpop.f32.mrf.mxu0 }
  0xb6   : > { %v703_v53 = vmul.f32 %v671_v51, %v455_v52 }
  0xb8   : > { %1379 = vmatmul.msk.f32.gmra.mxu1 %vm739_vm1, %v703_v53  ;;  %v1979_v39 = vpop.permute.xlu0 %621  ;;  %v590_v23 = vpop.permute.xlu1 %589 }
  0xb9   : > { %v676_v9 = vsel %vm329_vm0, %v1793_v27, %v590_v23  ;;  %v594_v27 = vpop.permute.xlu2 %593 }
  0xba   : > { %1371 = vmatmul.msk.f32.gmra.mxu3 %vm329_vm0, %v289_v29  ;;  %v678_v56 = vsel %vm329_vm0, %v1868_v47, %v594_v27 }
  0xbd   : > { %v458_v60 = vpop.f32.mrf.mxu0 }
  0xbe   : > { %v704_v62 = vmul.f32 %v672_v58, %v458_v60 }
  0xc0   : > { %1380 = vmatmul.msk.f32.gmra.mxu1 %vm739_vm1, %v704_v62  ;;  %v592_v33 = vpop.permute.xlu0 %591  ;;  %v1993_v53 = vpop.permute.xlu1 %625 }
  0xc1   : > { %v677_v50 = vsel %vm329_vm0, %v1808_v31, %v592_v33 }
  0xc2   : > { %1372 = vmatmul.msk.f32.gmra.mxu3 %vm329_vm0, %v290_v43 }
  0xc5   : > { %v461_v3 = vpop.f32.mrf.mxu0 }
  0xc6   : > { %v705_v4 = vmul.f32 %v673_v2, %v461_v3  ;;  %v2005_v3 = vpop.permute.xlu2 %629 }
  0xc8   : > { %1381 = vmatmul.msk.f32.gmra.mxu1 %vm739_vm1, %v705_v4  ;;  %v2000_v62 = vpop.permute.xlu0 %627  ;;  %v596_v31 = vpop.permute.xlu1 %595 }
  0xc9   : > { %v679_v16 = vsel %vm329_vm0, %v1829_v36, %v596_v31  ;;  %v494_v36 = vpop.f32.mrf.mxu3 }
  0xca   : > { %1373 = vmatmul.msk.f32.gmra.mxu3 %vm329_vm0, %v291_v14 }
  0xcd   : > { %v464_v22 = vpop.f32.mrf.mxu0 }
  0xce   : > { %v706_v8 = vmul.f32 %v674_v18, %v464_v22 }
  0xd0   : > { %1382 = vmatmul.msk.f32.gmra.mxu1 %vm739_vm1, %v706_v8  ;;  %v598_v4 = vpop.permute.xlu0 %597  ;;  %v2015_v22 = vpop.permute.xlu1 %631 }
  0xd1   : > { %v680_v47 = vsel %vm329_vm0, %v1847_v41, %v598_v4  ;;  %v600_v8 = vpop.permute.xlu2 %599 }
  0xd2   : > { %1374 = vmatmul.msk.f32.gmra.mxu3 %vm329_vm0, %v292_v13  ;;  %v681_v20 = vsel %vm329_vm0, %v1907_v59, %v600_v8  ;;  %v683_v59 = vsel %vm329_vm0, %v1700_v5, %v1913_v61  ;;  %v685_v5 = vsel %vm329_vm0, %v1721_v10, %v1924_v11  ;;  %v687_v10 = vsel %vm329_vm0, %v1767_v21, %v1944_v49 }
  0xd3   : > { %v689_v21 = vsel %vm329_vm0, %v1758_v19, %v1958_v0  ;;  %v691_v19 = vsel %vm329_vm0, %v1784_v25, %v1972_v26  ;;  %v693_v25 = vsel %vm329_vm0, %v1844_v40, %v1986_v46  ;;  %v695_v40 = vsel %vm329_vm0, %v1832_v37, %v2000_v62 }
  0xd4   : > { %v697_v37 = vsel %vm329_vm0, %v1871_v48, %v2015_v22 }
  0xd5   : > { %v467_v35 = vpop.f32.mrf.mxu0 }
  0xd6   : > { %v707_v38 = vmul.f32 %v675_v32, %v467_v35 }
  0xd8   : > { %1383 = vmatmul.msk.f32.gmra.mxu1 %vm739_vm1, %v707_v38  ;;  %v602_v35 = vpop.permute.xlu1 %601  ;;  %v497_v38 = vpop.f32.mrf.mxu3 }
  0xd9   : > { %v682_v41 = vsel %vm329_vm0, %v1891_v54, %v602_v35  ;;  %v684_v54 = vsel %vm329_vm0, %v1706_v6, %v1916_v63  ;;  %v717_v27 = vmul.f32 %v685_v5, %v497_v38  ;;  %v686_v6 = vsel %vm329_vm0, %v1729_v12, %v1937_v42 }
  0xda   : > { %v688_v12 = vsel %vm329_vm0, %v1749_v17, %v1951_v55  ;;  %v690_v17 = vsel %vm329_vm0, %v1805_v30, %v1965_v7  ;;  %v692_v30 = vsel %vm329_vm0, %v1796_v28, %v1979_v39  ;;  %v694_v28 = vsel %vm329_vm0, %v1820_v34, %v1993_v53 }
  0xdb   : > { %v696_v34 = vsel %vm329_vm0, %v1900_v57, %v2005_v3 }
  0xdd   : > { %v470_v44 = vpop.f32.mrf.mxu0 }
  0xde   : > { %v708_v45 = vmul.f32 %v676_v9, %v470_v44 }
  0xe0   : > { %1384 = vmatmul.msk.f32.gmra.mxu1 %vm739_vm1, %v708_v45  ;;  %v500_v9 = vpop.f32.mrf.mxu3 }
  0xe1   : > { %v718_v63 = vmul.f32 %v686_v6, %v500_v9 }
  0xe5   : > { %v473_v51 = vpop.f32.mrf.mxu0 }
  0xe6   : > { %v709_v52 = vmul.f32 %v677_v50, %v473_v51  ;;  %v716_v51 = vmul.f32 %v684_v54, %v494_v36 }
  0xe8   : > { %1385 = vmatmul.msk.f32.gmra.mxu1 %vm739_vm1, %v709_v52  ;;  %v503_v14 = vpop.f32.mrf.mxu3 }
  0xe9   : > { %v719_v11 = vmul.f32 %v687_v10, %v503_v14 }
  0xed   : > { %v476_v58 = vpop.f32.mrf.mxu0 }
  0xee   : > { %v710_v60 = vmul.f32 %v678_v56, %v476_v58 }
  0xf0   : > { %1386 = vmatmul.msk.f32.gmra.mxu1 %vm739_vm1, %v710_v60  ;;  %v506_v52 = vpop.f32.mrf.mxu3 }
  0xf1   : > { %v720_v60 = vmul.f32 %v688_v12, %v506_v52 }
  0xf5   : > { %v479_v1 = vpop.f32.mrf.mxu0 }
  0xf6   : > { %v711_v2 = vmul.f32 %v679_v16, %v479_v1 }
  0xf8   : > { %1387 = vmatmul.msk.f32.gmra.mxu1 %vm739_vm1, %v711_v2  ;;  %v509_v56 = vpop.f32.mrf.mxu3 }
  0xf9   : > { %v721_v16 = vmul.f32 %v689_v21, %v509_v56 }
  0xfd   : > { %v482_v15 = vpop.f32.mrf.mxu0 }
  0xfe   : > { %v712_v18 = vmul.f32 %v680_v47, %v482_v15 }
 0x100   : > { %1388 = vmatmul.msk.f32.gmra.mxu1 %vm739_vm1, %v712_v18 }
 0x105   : > { %v485_v29 = vpop.f32.mrf.mxu0 }
 0x106   : > { %v713_v32 = vmul.f32 %v681_v20, %v485_v29 }
 0x108   : > { %1389 = vmatmul.msk.f32.gmra.mxu1 %vm739_vm1, %v713_v32 }
 0x10d   : > { %v488_v23 = vpop.f32.mrf.mxu0 }
 0x10e   : > { %v714_v43 = vmul.f32 %v682_v41, %v488_v23 }
 0x110   : > { %1390 = vmatmul.msk.f32.gmra.mxu1 %vm739_vm1, %v714_v43 }
 0x115   : > { %v491_v44 = vpop.f32.mrf.mxu0  ;;  %v853_v45 = vpop.f32.mrf.mxu1 }
 0x116   : > { %v715_v33 = vmul.f32 %v683_v59, %v491_v44  ;;  %950 = vst.msk [vmem:[%s2028_s17] sm:$0xff] %vm949_vm2, %v853_v45  ;;  %v512_v42 = vpop.f32.mrf.mxu3 }
 0x117   : > { %v722_v55 = vmul.f32 %v690_v17, %v512_v42 }
 0x118   : > { %1391 = vmatmul.msk.f32.vlgmr.msra.gmra.mxu2 %vm739_vm1, %v715_v33 }
 0x11d   : > { %v856_v50 = vpop.f32.mrf.mxu1 }
 0x11e   : > { %951 = vst.msk [vmem:[%s2028_s17 + $0x8] sm:$0xff] %vm949_vm2, %v856_v50  ;;  %v515_v49 = vpop.f32.mrf.mxu3 }
 0x11f   : > { %v723_v0 = vmul.f32 %v691_v19, %v515_v49 }
 0x120   : > { %1392 = vmatmul.msk.f32.gmra.mxu2 %vm739_vm1, %v716_v51 }
 0x124   : > { %v634_v57 = vpop.permute.xlu0 %633 }
 0x125   : > { %v859_v61 = vpop.f32.mrf.mxu1  ;;  %v698_v43 = vsel %vm329_vm0, %v2009_v24, %v634_v57 }
 0x126   : > { %952 = vst.msk [vmem:[%s2028_s17 + $0x10] sm:$0xff] %vm949_vm2, %v859_v61  ;;  %v518_v4 = vpop.f32.mrf.mxu3 }
 0x127   : > { %v724_v7 = vmul.f32 %v692_v30, %v518_v4 }
 0x128   : > { %1393 = vmatmul.msk.f32.gmra.mxu2 %vm739_vm1, %v717_v27 }
 0x12d   : > { %v862_v13 = vpop.f32.mrf.mxu1 }
 0x12e   : > { %953 = vst.msk [vmem:[%s2028_s17 + $0x18] sm:$0xff] %vm949_vm2, %v862_v13  ;;  %v521_v15 = vpop.f32.mrf.mxu3 }
 0x12f   : > { %v725_v36 = vmul.f32 %v693_v25, %v521_v15 }
 0x130   : > { %1394 = vmatmul.msk.f32.gmra.mxu2 %vm739_vm1, %v718_v63 }
 0x135   : > { %v865_v58 = vpop.f32.mrf.mxu1 }
 0x136   : > { %954 = vst.msk [vmem:[%s2028_s17 + $0x20] sm:$0xff] %vm949_vm2, %v865_v58  ;;  %v524_v26 = vpop.f32.mrf.mxu3 }
 0x137   : > { %v726_v20 = vmul.f32 %v694_v28, %v524_v26 }
 0x138   : > { %1395 = vmatmul.msk.f32.gmra.mxu2 %vm739_vm1, %v719_v11 }
 0x13d   : > { %v868_v31 = vpop.f32.mrf.mxu1 }
 0x13e   : > { %955 = vst.msk [vmem:[%s2028_s17 + $0x28] sm:$0xff] %vm949_vm2, %v868_v31  ;;  %v527_v39 = vpop.f32.mrf.mxu3 }
 0x13f   : > { %v727_v46 = vmul.f32 %v695_v40, %v527_v39 }
 0x140   : > { %1396 = vmatmul.msk.f32.gmra.mxu2 %vm739_vm1, %v720_v60 }
 0x145   : > { %v871_v1 = vpop.f32.mrf.mxu1 }
 0x146   : > { %956 = vst.msk [vmem:[%s2028_s17 + $0x30] sm:$0xff] %vm949_vm2, %v871_v1  ;;  %v530_v35 = vpop.f32.mrf.mxu3 }
 0x147   : > { %v728_v53 = vmul.f32 %v696_v34, %v530_v35 }
 0x148   : > { %1397 = vmatmul.msk.f32.gmra.mxu2 %vm739_vm1, %v721_v16 }
 0x14d   : > { %v874_v2 = vpop.f32.mrf.mxu1 }
 0x14e   : > { %957 = vst.msk [vmem:[%s2028_s17 + $0x38] sm:$0xff] %vm949_vm2, %v874_v2  ;;  %v533_v41 = vpop.f32.mrf.mxu3 }
 0x14f   : > { %v729_v62 = vmul.f32 %v697_v37, %v533_v41 }
 0x150   : > { %1398 = vmatmul.msk.f32.gmra.mxu2 %vm739_vm1, %v722_v55 }
 0x155   : > { %v877_v47 = vpop.f32.mrf.mxu1 }
 0x156   : > { %958 = vst.msk [vmem:[%s2028_s17 + $0x40] sm:$0xff] %vm949_vm2, %v877_v47  ;;  %v536_v3 = vpop.f32.mrf.mxu3 }
 0x157   : > { %v730_v9 = vmul.f32 %v698_v43, %v536_v3 }
 0x158   : > { %1399 = vmatmul.msk.f32.gmra.mxu2 %vm739_vm1, %v723_v0 }
 0x15d   : > { %v880_v18 = vpop.f32.mrf.mxu1 }
 0x15e   : > { %959 = vst.msk [vmem:[%s2028_s17 + $0x48] sm:$0xff] %vm949_vm2, %v880_v18 }
 0x160   : > { %1400 = vmatmul.msk.f32.gmra.mxu2 %vm739_vm1, %v724_v7 }
 0x165   : > { %v883_v8 = vpop.f32.mrf.mxu1 }
 0x166   : > { %960 = vst.msk [vmem:[%s2028_s17 + $0x50] sm:$0xff] %vm949_vm2, %v883_v8 }
 0x168   : > { %1401 = vmatmul.msk.f32.gmra.mxu2 %vm739_vm1, %v725_v36 }
 0x16d   : > { %v886_v29 = vpop.f32.mrf.mxu1 }
 0x16e   : > { %961 = vst.msk [vmem:[%s2028_s17 + $0x58] sm:$0xff] %vm949_vm2, %v886_v29 }
 0x170   : > { %1402 = vmatmul.msk.f32.gmra.mxu2 %vm739_vm1, %v726_v20 }
 0x175   : > { %v889_v32 = vpop.f32.mrf.mxu1 }
 0x176   : > { %962 = vst.msk [vmem:[%s2028_s17 + $0x60] sm:$0xff] %vm949_vm2, %v889_v32 }
 0x178   : > { %1403 = vmatmul.msk.f32.gmra.mxu2 %vm739_vm1, %v727_v46 }
 0x17d   : > { %v892_v38 = vpop.f32.mrf.mxu1 }
 0x17e   : > { %963 = vst.msk [vmem:[%s2028_s17 + $0x68] sm:$0xff] %vm949_vm2, %v892_v38 }
 0x180   : > { %1404 = vmatmul.msk.f32.gmra.mxu2 %vm739_vm1, %v728_v53 }
 0x185   : > { %v895_v23 = vpop.f32.mrf.mxu1 }
 0x186   : > { %964 = vst.msk [vmem:[%s2028_s17 + $0x70] sm:$0xff] %vm949_vm2, %v895_v23 }
 0x188   : > { %1405 = vmatmul.msk.f32.gmra.mxu2 %vm739_vm1, %v729_v62 }
 0x18d   : > { %v898_v44 = vpop.f32.mrf.mxu1 }
 0x18e   : > { %965 = vst.msk [vmem:[%s2028_s17 + $0x78] sm:$0xff] %vm949_vm2, %v898_v44 }
 0x190   : > { %1406 = vmatmul.msk.f32.gmra.mxu2 %vm739_vm1, %v730_v9 }
 0x19b   : > { %v901_v48 = vpop.f32.mrf.mxu2 }
 0x19c   : > { %966 = vst.msk [vmem:[%s2028_s17 + $0x80] sm:$0xff] %vm949_vm2, %v901_v48 }
 0x1a3   : > { %v904_v22 = vpop.f32.mrf.mxu2 }
 0x1a4   : > { %967 = vst.msk [vmem:[%s2028_s17 + $0x88] sm:$0xff] %vm949_vm2, %v904_v22 }
 0x1ab   : > { %v907_v59 = vpop.f32.mrf.mxu2 }
 0x1ac   : > { %968 = vst.msk [vmem:[%s2028_s17 + $0x90] sm:$0xff] %vm949_vm2, %v907_v59 }
 0x1b3   : > { %v910_v24 = vpop.f32.mrf.mxu2 }
 0x1b4   : > { %969 = vst.msk [vmem:[%s2028_s17 + $0x98] sm:$0xff] %vm949_vm2, %v910_v24 }
 0x1bb   : > { %v913_v45 = vpop.f32.mrf.mxu2 }
 0x1bc   : > { %970 = vst.msk [vmem:[%s2028_s17 + $0xa0] sm:$0xff] %vm949_vm2, %v913_v45 }
 0x1c3   : > { %v916_v33 = vpop.f32.mrf.mxu2 }
 0x1c4   : > { %971 = vst.msk [vmem:[%s2028_s17 + $0xa8] sm:$0xff] %vm949_vm2, %v916_v33 }
 0x1cb   : > { %v919_v54 = vpop.f32.mrf.mxu2 }
 0x1cc   : > { %972 = vst.msk [vmem:[%s2028_s17 + $0xb0] sm:$0xff] %vm949_vm2, %v919_v54 }
 0x1d3   : > { %v922_v14 = vpop.f32.mrf.mxu2 }
 0x1d4   : > { %973 = vst.msk [vmem:[%s2028_s17 + $0xb8] sm:$0xff] %vm949_vm2, %v922_v14 }
 0x1db   : > { %v925_v50 = vpop.f32.mrf.mxu2 }
 0x1dc   : > { %974 = vst.msk [vmem:[%s2028_s17 + $0xc0] sm:$0xff] %vm949_vm2, %v925_v50 }
 0x1e3   : > { %v928_v51 = vpop.f32.mrf.mxu2 }
 0x1e4   : > { %975 = vst.msk [vmem:[%s2028_s17 + $0xc8] sm:$0xff] %vm949_vm2, %v928_v51 }
 0x1eb   : > { %v931_v5 = vpop.f32.mrf.mxu2 }
 0x1ec   : > { %976 = vst.msk [vmem:[%s2028_s17 + $0xd0] sm:$0xff] %vm949_vm2, %v931_v5 }
 0x1f3   : > { %v934_v61 = vpop.f32.mrf.mxu2 }
 0x1f4   : > { %977 = vst.msk [vmem:[%s2028_s17 + $0xd8] sm:$0xff] %vm949_vm2, %v934_v61 }
 0x1fb   : > { %v937_v52 = vpop.f32.mrf.mxu2 }
 0x1fc   : > { %978 = vst.msk [vmem:[%s2028_s17 + $0xe0] sm:$0xff] %vm949_vm2, %v937_v52 }
 0x203   : > { %v940_v27 = vpop.f32.mrf.mxu2 }
 0x204   : > { %979 = vst.msk [vmem:[%s2028_s17 + $0xe8] sm:$0xff] %vm949_vm2, %v940_v27 }
 0x20b   : > { %v943_v6 = vpop.f32.mrf.mxu2 }
 0x20c   : > { %980 = vst.msk [vmem:[%s2028_s17 + $0xf0] sm:$0xff] %vm949_vm2, %v943_v6 }
 0x210   : > { %988 = sbr.rel (!%p1667_p4) target bundleno = 597 (0x255), region = 40 }
 0x213   : > { %v946_v63 = vpop.f32.mrf.mxu2 }
 0x214   : > { %981 = vst.msk [vmem:[%s2028_s17 + $0xf8] sm:$0xff] %vm949_vm2, %v946_v63 }
 0x215   : > { %s2311_s15 = smov (!%p991_p8, %s990_s15), 32 }
 0x216   : > { %s1409_s26 = sshll.u32 %s2311_s15, 3 }
 0x217   : > { %p1412_p9 = scmp.eq.s32.totalorder %s1409_s26, 0 }
 0x218   : > { %s2167_s27 = sshrl.u32 (!%p1412_p9), %s2311_s15, 5 }
 0x219   : > { %999 = sbr.rel (%p1412_p9) target bundleno = 597 (0x255), region = 44  ;;  %p1413_p10 = scmp.le.s32.totalorder (!%p1412_p9), %s2167_s27, 0 }
 0x21e   : > { %1284 = sbr.rel (%p1413_p10) target bundleno = 580 (0x244), region = 123  ;;  %s2302_s18 = smov (!%p1413_p10), %s2161_s25 }
 0x21f   : > { %s2303_s23 = smov (!%p1413_p10), %s2028_s17  ;;  %s2176_s28 = smov (!%p1413_p10), 0  }
 0x220   : > { %s2178_s29 = smov (!%p1413_p10), 0  }
 0x223 LB: >> { %v1124_v13 = vld [vmem:[%s1590_s23] sm:$0xff]  ;;  %v1126_v56 = vld [vmem:[%s1590_s23 + $0x8] sm:$0xff]  ;;  %v1128_v10 = vld [vmem:[%s1590_s23 + $0x10] sm:$0xff]  ;;  %s1188_s30 = sadd.s32 1, %s1594_s28  ;;  %s1118_s29 = sadd.s32 1, %s1598_s29   ;;  %s1598_s29 = sphi %s2178_s29, %s1118_s29   ;;  %s1594_s28 = sphi %s2176_s28, %s2306_s28   ;;  %s1590_s23 = sphi %s2303_s23, %s2305_s23   ;;  %s1586_s18 = sphi %s2302_s18, %s2304_s18  }
 0x224   : >> { %1125 = vst [vmem:[%s1586_s18] sm:$0xff] %v1124_v13  ;;  %v1130_v11 = vld [vmem:[%s1590_s23 + $0x18] sm:$0xff]  ;;  %p1189_p11 = scmp.ge.s32.totalorder %s1188_s30, %s2167_s27  ;;  %v1132_v58 = vld [vmem:[%s1590_s23 + $0x20] sm:$0xff]  ;;  %v1134_v12 = vld [vmem:[%s1590_s23 + $0x28] sm:$0xff]  ;;  %p1117_p12 = scmp.ge.s32.totalorder %s1118_s29, %s2167_s27 }
 0x225   : >> { %1127 = vst [vmem:[%s1586_s18 + $0x8] sm:$0xff] %v1126_v56  ;;  %v1136_v42 = vld [vmem:[%s1590_s23 + $0x30] sm:$0xff]  ;;  %v1138_v60 = vld [vmem:[%s1590_s23 + $0x38] sm:$0xff]  ;;  %v1140_v31 = vld [vmem:[%s1590_s23 + $0x40] sm:$0xff] }
 0x226   : >> { %1129 = vst [vmem:[%s1586_s18 + $0x10] sm:$0xff] %v1128_v10  ;;  %s2313_s30 = smov (%p1189_p11, %s1188_s30), 0  ;;  %v1142_v21 = vld [vmem:[%s1590_s23 + $0x48] sm:$0xff]  ;;  %v1144_v49 = vld [vmem:[%s1590_s23 + $0x50] sm:$0xff]  ;;  %v1146_v16 = vld [vmem:[%s1590_s23 + $0x58] sm:$0xff] }
 0x227   : >> { %1131 = vst [vmem:[%s1586_s18 + $0x18] sm:$0xff] %v1130_v11  ;;  %s1414_s5 = sshll.u32 %s2313_s30, 8  ;;  %v1148_v1 = vld [vmem:[%s1590_s23 + $0x60] sm:$0xff]  ;;  %v1150_v17 = vld [vmem:[%s1590_s23 + $0x68] sm:$0xff]  ;;  %v1152_v55 = vld [vmem:[%s1590_s23 + $0x70] sm:$0xff]  ;;  %s2306_s28 = smov %s2313_s30 }
 0x228   : >> { %1133 = vst [vmem:[%s1586_s18 + $0x20] sm:$0xff] %v1132_v58  ;;  %s2210_s6 = scalar_lea.vmem %s2028_s17, %s1414_s5 [#allocation2]   ;;  %s2213_s7 = scalar_lea.vmem %s2161_s25, %s1414_s5   ;;  %v1154_v2 = vld [vmem:[%s1590_s23 + $0x78] sm:$0xff]  ;;  %v1156_v4 = vld [vmem:[%s1590_s23 + $0x80] sm:$0xff]  ;;  %v1158_v19 = vld [vmem:[%s1590_s23 + $0x88] sm:$0xff] }
 0x229   : >> { %1135 = vst [vmem:[%s1586_s18 + $0x28] sm:$0xff] %v1134_v12  ;;  %v1160_v0 = vld [vmem:[%s1590_s23 + $0x90] sm:$0xff]  ;;  %v1162_v47 = vld [vmem:[%s1590_s23 + $0x98] sm:$0xff]  ;;  %v1164_v15 = vld [vmem:[%s1590_s23 + $0xa0] sm:$0xff] }
 0x22a   : >> { %1137 = vst [vmem:[%s1586_s18 + $0x30] sm:$0xff] %v1136_v42  ;;  %v1166_v30 = vld [vmem:[%s1590_s23 + $0xa8] sm:$0xff]  ;;  %v1168_v7 = vld [vmem:[%s1590_s23 + $0xb0] sm:$0xff]  ;;  %v1170_v18 = vld [vmem:[%s1590_s23 + $0xb8] sm:$0xff] }
 0x22b   : >> { %1139 = vst [vmem:[%s1586_s18 + $0x38] sm:$0xff] %v1138_v60  ;;  %v1172_v25 = vld [vmem:[%s1590_s23 + $0xc0] sm:$0xff]  ;;  %v1174_v26 = vld [vmem:[%s1590_s23 + $0xc8] sm:$0xff]  ;;  %v1176_v36 = vld [vmem:[%s1590_s23 + $0xd0] sm:$0xff] }
 0x22c   : >> { %1141 = vst [vmem:[%s1586_s18 + $0x40] sm:$0xff] %v1140_v31  ;;  %v1178_v8 = vld [vmem:[%s1590_s23 + $0xd8] sm:$0xff]  ;;  %v1180_v28 = vld [vmem:[%s1590_s23 + $0xe0] sm:$0xff]  ;;  %v1182_v39 = vld [vmem:[%s1590_s23 + $0xe8] sm:$0xff] }
 0x22d   : >> { %1143 = vst [vmem:[%s1586_s18 + $0x48] sm:$0xff] %v1142_v21  ;;  %v1184_v20 = vld [vmem:[%s1590_s23 + $0xf0] sm:$0xff]  ;;  %v1186_v29 = vld [vmem:[%s1590_s23 + $0xf8] sm:$0xff]  ;;  %s2305_s23 = smov %s2210_s6 }
 0x22e   : >> { %1145 = vst [vmem:[%s1586_s18 + $0x50] sm:$0xff] %v1144_v49 }
 0x22f   : >> { %1147 = vst [vmem:[%s1586_s18 + $0x58] sm:$0xff] %v1146_v16 }
 0x230   : >> { %1149 = vst [vmem:[%s1586_s18 + $0x60] sm:$0xff] %v1148_v1 }
 0x231   : >> { %1151 = vst [vmem:[%s1586_s18 + $0x68] sm:$0xff] %v1150_v17 }
 0x232   : >> { %1153 = vst [vmem:[%s1586_s18 + $0x70] sm:$0xff] %v1152_v55 }
 0x233   : >> { %1155 = vst [vmem:[%s1586_s18 + $0x78] sm:$0xff] %v1154_v2 }
 0x234   : >> { %1157 = vst [vmem:[%s1586_s18 + $0x80] sm:$0xff] %v1156_v4 }
 0x235   : >> { %1159 = vst [vmem:[%s1586_s18 + $0x88] sm:$0xff] %v1158_v19 }
 0x236   : >> { %1161 = vst [vmem:[%s1586_s18 + $0x90] sm:$0xff] %v1160_v0 }
 0x237   : >> { %1163 = vst [vmem:[%s1586_s18 + $0x98] sm:$0xff] %v1162_v47 }
 0x238   : >> { %1165 = vst [vmem:[%s1586_s18 + $0xa0] sm:$0xff] %v1164_v15 }
 0x239   : >> { %1167 = vst [vmem:[%s1586_s18 + $0xa8] sm:$0xff] %v1166_v30 }
 0x23a   : >> { %1169 = vst [vmem:[%s1586_s18 + $0xb0] sm:$0xff] %v1168_v7 }
 0x23b   : >> { %1171 = vst [vmem:[%s1586_s18 + $0xb8] sm:$0xff] %v1170_v18 }
 0x23c   : >> { %1173 = vst [vmem:[%s1586_s18 + $0xc0] sm:$0xff] %v1172_v25 }
 0x23d   : >> { %1175 = vst [vmem:[%s1586_s18 + $0xc8] sm:$0xff] %v1174_v26 }
 0x23e   : >> { %1177 = vst [vmem:[%s1586_s18 + $0xd0] sm:$0xff] %v1176_v36 }
 0x23f   : >> { %1179 = vst [vmem:[%s1586_s18 + $0xd8] sm:$0xff] %v1178_v8  ;;  %1120 = sbr.rel (!%p1117_p12) target bundleno = 547 (0x223), region = 129 }
 0x240   : >> { %1181 = vst [vmem:[%s1586_s18 + $0xe0] sm:$0xff] %v1180_v28 }
 0x241   : >> { %1183 = vst [vmem:[%s1586_s18 + $0xe8] sm:$0xff] %v1182_v39 }
 0x242   : >> { %1185 = vst [vmem:[%s1586_s18 + $0xf0] sm:$0xff] %v1184_v20 }
 0x243   : >> { %1187 = vst [vmem:[%s1586_s18 + $0xf8] sm:$0xff] %v1186_v29  ;;  %s2304_s18 = smov %s2213_s7 }
 0x244 PF: > { %s2278_s8 = sand.u32 31, %s2311_s15   ;;  %s1425_s9 = sshll.u32 %s2167_s27, 8 }
 0x245   : > { %s1199_s10 = scalar_lea.vmem %s2028_s17, %s1425_s9 [#allocation2]   ;;  %s1201_s12 = scalar_lea.vmem %s2161_s25, %s1425_s9  }
 0x246   : > { %p1419_p13 = scmp.le.s32.totalorder %s2278_s8, 0 }
 0x247   : > { %s1600_s13 = smov (!%p1419_p13), %s1201_s12   ;;  %s1604_s11 = smov (!%p1419_p13), %s1199_s10  }
 0x248   : > { %1298 = sbr.rel (%p1419_p13) target bundleno = 597 (0x255), region = 134  ;;  %s1608_s14 = smov (!%p1419_p13), 0  }
 0x249   : > { %s1612_s20 = smov (!%p1419_p13), 0  }
 0x24d LB: >> { %v1211_v40 = vld [vmem:[%s1606_s11] sm:$0xff]  ;;  %s1213_s15 = sadd.s32 1, %s1610_s14  ;;  %s1205_s20 = sadd.s32 1, %s1614_s20   ;;  %s1614_s20 = sphi %s1612_s20, %s1205_s20   ;;  %s1610_s14 = sphi %s1608_s14, %s1609_s14   ;;  %s1606_s11 = sphi %s1604_s11, %s1218_s11   ;;  %s1602_s13 = sphi %s1600_s13, %s1219_s13  }
 0x24e   : >> { %1212 = vst [vmem:[%s1602_s13] sm:$0xff] %v1211_v40  ;;  %p1214_p0 = scmp.ge.s32.totalorder %s1213_s15, %s2278_s8  ;;  %p1204_p1 = scmp.ge.s32.totalorder %s1205_s20, %s2278_s8 }
 0x250   : >> { %s2315_s15 = smov (%p1214_p0, %s1213_s15), 0  ;;  %1207 = sbr.rel (!%p1204_p1) target bundleno = 589 (0x24d), region = 140 }
 0x251   : >> { %s1420_s17 = sshll.u32 %s2315_s15, 3  ;;  %s1609_s14 = smov %s2315_s15  }
 0x252   : >> { %s1218_s11 = scalar_lea.vmem %s1199_s10, %s1420_s17 [#allocation2]   ;;  %s1219_s13 = scalar_lea.vmem %s1201_s12, %s1420_s17  }
 0x255 PF: > { %p11_p2 = scmp.ge.s32.totalorder %s1657_s19, 6   ;;  %s2307_s15 = smov %s1578_s16 }
 0x256   : > { %s2308_s16 = smov %s1665_s22  ;;  %s2309_s17 = smov %s1657_s19 }
 0x257   :  { %13 = sbr.rel (!%p11_p2) target bundleno = 2 (0x2), region = 151 }

</bundles_post_ra>
